<compile_context>
chip_gen: v7x
topology: tpu7x:2x2x1
jax: 0.10.0
libtpu: 0.0.40
codegen_flags: <defaults>
</compile_context>

<pallas_src>
import math

import jax
import jax.numpy as jnp
from jax.experimental import pallas as pl
from jax.experimental.pallas import tpu as pltpu


def mlp_kernel(x_ref, wup_ref, wgate_ref, wdown_ref, o_ref, acc_ref):
    """One (row-tile i, hidden-tile j) step of the SwiGLU MLP.

    x_ref:     (bm, C)   compute dtype (bf16)   — resident across j
    wup_ref:   (C, bh)   compute dtype
    wgate_ref: (C, bh)   compute dtype
    wdown_ref: (bh, C)   compute dtype
    o_ref:     (bm, C)   output dtype            — resident across j
    acc_ref:   (bm, C)   f32 scratch accumulator — resident across j
    """
    j = pl.program_id(1)

    @pl.when(j == 0)
    def _():
        acc_ref[...] = jnp.zeros_like(acc_ref)

    x = x_ref[...]
    # up / gate for this hidden slice: full contraction over C -> exact per tile.
    up = jnp.dot(x, wup_ref[...], preferred_element_type=jnp.float32)
    g = jnp.dot(x, wgate_ref[...], preferred_element_type=jnp.float32)
    # SiLU + gating in f32 (sigmoid goes to the EUP slot, essentially free
    # next to the MXU work); cast the gated slice to bf16 for the down matmul.
    h = (up * (g * jax.nn.sigmoid(g))).astype(wdown_ref.dtype)
    # Streamed reduction over H into the f32 accumulator.
    acc_ref[...] += jnp.dot(h, wdown_ref[...], preferred_element_type=jnp.float32)

    @pl.when(j == pl.num_programs(1) - 1)
    def _():
        o_ref[...] = acc_ref[...].astype(o_ref.dtype)
        # TODO(synk): dropout is identity (p=0.0 / eval mode); training-mode
        # dropout would use pltpu.prng_seed + pltpu.prng_random_bits here.


def _pick_block(total, preferred, align):
    """Largest multiple of `align` that divides `total`, <= preferred; else full dim."""
    if total % align != 0:
        return total  # small/odd extents: the full dim is always a legal block
    cand = min(preferred, total)
    cand -= cand % align
    while cand >= align:
        if total % cand == 0:
            return cand
        cand -= align
    return total


def _auto_blocks(M, C, H, in_itemsize):
    """Pick (block_m, block_h) under a VMEM budget.

    block_m: big enough to amortize weight re-streaming across row tiles,
             small enough that (bm, C) activation tiles stay cheap.
    block_h: as large as fits (prefer full H so weight blocks become grid-
             invariant and are fetched from HBM exactly once); otherwise the
             largest lane-aligned divisor that keeps the 3 double-buffered
             (C, bh)/(bh, C) weight slabs under ~24 MiB.
    """
    block_m = _pick_block(M, 256, 8)
    weight_budget = 24 * 1024 * 1024  # for 3 weight tiles x 2 pipeline buffers
    bh_cap = weight_budget // (6 * C * in_itemsize)
    bh_cap = max(128, (bh_cap // 128) * 128)
    block_h = _pick_block(H, bh_cap, 128)
    return block_m, block_h


def mlp_forward(x, w_up, w_gate, w_down, *, block_m=None, block_h=None,
                compute_dtype=jnp.bfloat16):
    """x: (B, T, C); weights: (C, 4C), (C, 4C), (4C, C). Returns (B, T, C)."""
    B, T, C = x.shape
    H = w_up.shape[1]
    M = B * T

    in_itemsize = jnp.dtype(compute_dtype).itemsize
    auto_m, auto_h = _auto_blocks(M, C, H, in_itemsize)
    if block_m is None:
        block_m = auto_m
    if block_h is None:
        block_h = auto_h
    assert M % block_m == 0 and H % block_h == 0
    assert block_m == M or block_m % 8 == 0
    assert block_h == H or block_h % 128 == 0
    # Lane-dense output: C should be a multiple of 128 for unmasked stores
    # (full-dim blocks are still legal for smaller C, just slower writeback).

    x2 = x.reshape(M, C).astype(compute_dtype)
    wu = w_up.astype(compute_dtype)
    wg = w_gate.astype(compute_dtype)
    wd = w_down.astype(compute_dtype)

    grid = (M // block_m, H // block_h)

    cost = pl.CostEstimate(
        flops=6 * M * C * H + 3 * M * H,
        transcendentals=M * H,
        bytes_accessed=int((x2.size + wu.size + wg.size + wd.size) * in_itemsize
                           + M * C * jnp.dtype(x.dtype).itemsize),
    )

    out2 = pl.pallas_call(
        mlp_kernel,
        out_shape=jax.ShapeDtypeStruct((M, C), x.dtype),
        grid_spec=pltpu.PrefetchScalarGridSpec(
            num_scalar_prefetch=0,
            grid=grid,
            in_specs=[
                pl.BlockSpec((block_m, C), lambda i, j: (i, 0)),   # x rows
                pl.BlockSpec((C, block_h), lambda i, j: (0, j)),   # W_up tile
                pl.BlockSpec((C, block_h), lambda i, j: (0, j)),   # W_gate tile
                pl.BlockSpec((block_h, C), lambda i, j: (j, 0)),   # W_down tile
            ],
            out_specs=pl.BlockSpec((block_m, C), lambda i, j: (i, 0)),
            scratch_shapes=[pltpu.VMEM((block_m, C), jnp.float32)],
        ),
        compiler_params=pltpu.CompilerParams(
            dimension_semantics=("parallel", "arbitrary"),
            vmem_limit_bytes=48 * 1024 * 1024,
        ),
        cost_estimate=cost,
    )(x2, wu, wg, wd)

    return out2.reshape(B, T, C)


def init_params(key, n_embd, n_layer, dtype=jnp.float32):
    """Deterministic init matching the PyTorch module's __init__ statistics."""
    scale = 0.02
    k1, k2, k3 = jax.random.split(key, 3)
    hidden = 4 * n_embd
    # nn.Linear stores (out, in); we store (in, out) so y = x @ W.
    w_up = (scale * jax.random.normal(k1, (n_embd, hidden))).astype(dtype)
    w_gate = (scale * jax.random.normal(k2, (n_embd, hidden))).astype(dtype)
    w_down = (
        (scale / math.sqrt(2 * n_layer))
        * jax.random.normal(k3, (hidden, n_embd))
    ).astype(dtype)
    return w_up, w_gate, w_down


def mlp_reference(x, w_up, w_gate, w_down, compute_dtype=jnp.bfloat16):
    """Pure-JAX reference using the same bf16-operand / f32-accum path."""
    B, T, C = x.shape
    xb = x.reshape(B * T, C).astype(compute_dtype)
    up = jnp.dot(xb, w_up.astype(compute_dtype), preferred_element_type=jnp.float32)
    g = jnp.dot(xb, w_gate.astype(compute_dtype), preferred_element_type=jnp.float32)
    h = (up * (g * jax.nn.sigmoid(g))).astype(compute_dtype)
    out = jnp.dot(h, w_down.astype(compute_dtype), preferred_element_type=jnp.float32)
    return out.reshape(B, T, C).astype(x.dtype)


if __name__ == "__main__":
    # Small config consistent with the module: batch=2, seq=8, n_embd=128
    # (lane-dense C), hidden = 4*n_embd = 512, n_layer=4.
    B, T, n_embd, n_layer = 2, 8, 128, 4

    key = jax.random.PRNGKey(0)
    kx, kw = jax.random.split(key)
    x = jax.random.normal(kx, (B, T, n_embd), dtype=jnp.float32)
    w_up, w_gate, w_down = init_params(kw, n_embd, n_layer)

    ref = mlp_reference(x, w_up, w_gate, w_down)

    # 1) Auto-tiled path: at this size the hidden axis collapses to one tile
    #    (weights resident in VMEM, fetched once).
    out_auto = jax.block_until_ready(mlp_forward(x, w_up, w_gate, w_down))
    assert out_auto.shape == (B, T, n_embd)
    assert jnp.allclose(out_auto, ref, atol=1e-3, rtol=1e-2), "auto-tiled mismatch"

    # 2) Forced small tiles (block_m=8, block_h=256 -> 2x2 grid): exercises the
    #    parallel row axis and the streamed-H accumulation path.
    out_tiled = jax.block_until_ready(
        mlp_forward(x, w_up, w_gate, w_down, block_m=8, block_h=256))
    assert jnp.allclose(out_tiled, ref, atol=1e-3, rtol=1e-2), "H-tiled mismatch"

    # bf16 matmul operands + f32 accumulation: only summation-order-level
    # differences vs the reference, so the tolerances above stay tight.
    print("KERNEL_OK")
</pallas_src>

<mosaic_0001>
module attributes {stable_mosaic.version = 11 : i64} {
  func.func @mlp_kernel(%arg0: i32, %arg1: i32, %arg2: memref<16x128xbf16, #tpu.memory_space<vmem>>, %arg3: memref<128x512xbf16, #tpu.memory_space<vmem>>, %arg4: memref<128x512xbf16, #tpu.memory_space<vmem>>, %arg5: memref<512x128xbf16, #tpu.memory_space<vmem>>, %arg6: memref<16x128xf32, #tpu.memory_space<vmem>>, %arg7: memref<16x128xf32, #tpu.memory_space<vmem>>) attributes {dimension_semantics = [#tpu.dimension_semantics<parallel>, #tpu.dimension_semantics<arbitrary>], iteration_bounds = array<i64: 1, 1>, scalar_prefetch = 0 : i64, scratch_operands = 1 : i64, tpu.core_type = #tpu.core_type<tc>, window_params = [{transform_indices = @transform_0, window_bounds = array<i64: 16, 128>}, {transform_indices = @transform_1, window_bounds = array<i64: 128, 512>}, {transform_indices = @transform_2, window_bounds = array<i64: 128, 512>}, {transform_indices = @transform_3, window_bounds = array<i64: 512, 128>}, {transform_indices = @transform_4, window_bounds = array<i64: 16, 128>}]} {
    %c0_i32 = arith.constant 0 : i32
    %0 = arith.cmpi eq, %arg1, %c0_i32 : i32
    %1 = arith.extui %0 : i1 to i32
    %c0_i32_0 = arith.constant 0 : i32
    %2 = arith.cmpi ne, %1, %c0_i32_0 : i32
    scf.if %2 {
      %cst_17 = arith.constant 0.000000e+00 : f32
      %24 = vector.broadcast %cst_17 : f32 to vector<16x128xf32>
      %c0_18 = arith.constant 0 : index
      %c0_19 = arith.constant 0 : index
      %25 = vector.load %arg7[%c0_18, %c0_19] : memref<16x128xf32, #tpu.memory_space<vmem>>, vector<16x128xf32>
      tpu.vector_store %arg7[%c0_18, %c0_19], %24 {strides = array<i32>} : memref<16x128xf32, #tpu.memory_space<vmem>>, vector<16x128xf32>,
    } else {
    }
    %c0 = arith.constant 0 : index
    %c0_1 = arith.constant 0 : index
    %3 = vector.load %arg2[%c0, %c0_1] : memref<16x128xbf16, #tpu.memory_space<vmem>>, vector<16x128xbf16>
    %c0_2 = arith.constant 0 : index
    %c0_3 = arith.constant 0 : index
    %4 = vector.load %arg3[%c0_2, %c0_3] : memref<128x512xbf16, #tpu.memory_space<vmem>>, vector<128x512xbf16>
    %cst = arith.constant dense<0.000000e+00> : vector<16x512xf32>
    %5 = tpu.matmul %3, %4, %cst {dimension_numbers = #tpu.dot_dimension_numbers<[1], [0], [0], [1], [0, 0, 1, 1], [], []>} : vector<16x128xbf16>, vector<128x512xbf16>, vector<16x512xf32> -> vector<16x512xf32>
    %c0_4 = arith.constant 0 : index
    %c0_5 = arith.constant 0 : index
    %6 = vector.load %arg4[%c0_4, %c0_5] : memref<128x512xbf16, #tpu.memory_space<vmem>>, vector<128x512xbf16>
    %cst_6 = arith.constant dense<0.000000e+00> : vector<16x512xf32>
    %7 = tpu.matmul %3, %6, %cst_6 {dimension_numbers = #tpu.dot_dimension_numbers<[1], [0], [0], [1], [0, 0, 1, 1], [], []>} : vector<16x128xbf16>, vector<128x512xbf16>, vector<16x512xf32> -> vector<16x512xf32>
    %8 = arith.negf %7 : vector<16x512xf32>
    %9 = math.exp %8 : vector<16x512xf32>
    %cst_7 = arith.constant 1.000000e+00 : f32
    %10 = vector.broadcast %cst_7 : f32 to vector<16x512xf32>
    %11 = arith.addf %10, %9 : vector<16x512xf32>
    %12 = arith.divf %10, %11 : vector<16x512xf32>
    %13 = arith.mulf %7, %12 : vector<16x512xf32>
    %14 = arith.mulf %5, %13 : vector<16x512xf32>
    %15 = arith.truncf %14 : vector<16x512xf32> to vector<16x512xbf16>
    %c0_8 = arith.constant 0 : index
    %c0_9 = arith.constant 0 : index
    %16 = vector.load %arg7[%c0_8, %c0_9] : memref<16x128xf32, #tpu.memory_space<vmem>>, vector<16x128xf32>
    %c0_10 = arith.constant 0 : index
    %c0_11 = arith.constant 0 : index
    %17 = vector.load %arg5[%c0_10, %c0_11] : memref<512x128xbf16, #tpu.memory_space<vmem>>, vector<512x128xbf16>
    %cst_12 = arith.constant dense<0.000000e+00> : vector<16x128xf32>
    %18 = tpu.matmul %15, %17, %cst_12 {dimension_numbers = #tpu.dot_dimension_numbers<[1], [0], [0], [1], [0, 0, 1, 1], [], []>} : vector<16x512xbf16>, vector<512x128xbf16>, vector<16x128xf32> -> vector<16x128xf32>
    %19 = arith.addf %16, %18 : vector<16x128xf32>
    %c0_13 = arith.constant 0 : index
    %c0_14 = arith.constant 0 : index
    %20 = vector.load %arg7[%c0_13, %c0_14] : memref<16x128xf32, #tpu.memory_space<vmem>>, vector<16x128xf32>
    tpu.vector_store %arg7[%c0_13, %c0_14], %19 {strides = array<i32>} : memref<16x128xf32, #tpu.memory_space<vmem>>, vector<16x128xf32>,
    %c0_i32_15 = arith.constant 0 : i32
    %21 = arith.cmpi eq, %arg1, %c0_i32_15 : i32
    %22 = arith.extui %21 : i1 to i32
    %c0_i32_16 = arith.constant 0 : i32
    %23 = arith.cmpi ne, %22, %c0_i32_16 : i32
    scf.if %23 {
      %c0_17 = arith.constant 0 : index
      %c0_18 = arith.constant 0 : index
      %24 = vector.load %arg7[%c0_17, %c0_18] : memref<16x128xf32, #tpu.memory_space<vmem>>, vector<16x128xf32>
      %c0_19 = arith.constant 0 : index
      %c0_20 = arith.constant 0 : index
      %25 = vector.load %arg6[%c0_19, %c0_20] : memref<16x128xf32, #tpu.memory_space<vmem>>, vector<16x128xf32>
      tpu.vector_store %arg6[%c0_19, %c0_20], %24 {strides = array<i32>} : memref<16x128xf32, #tpu.memory_space<vmem>>, vector<16x128xf32>,
    } else {
    }
    return
  }
  func.func @transform_0(%arg0: i32, %arg1: i32) -> (i32, i32) {
    %c0_i32 = arith.constant 0 : i32
    %c0_i32_0 = arith.constant 0 : i32
    return %arg0, %c0_i32 : i32, i32
  }
  func.func @transform_1(%arg0: i32, %arg1: i32) -> (i32, i32) {
    %c0_i32 = arith.constant 0 : i32
    %c0_i32_0 = arith.constant 0 : i32
    return %c0_i32, %arg1 : i32, i32
  }
  func.func @transform_2(%arg0: i32, %arg1: i32) -> (i32, i32) {
    %c0_i32 = arith.constant 0 : i32
    %c0_i32_0 = arith.constant 0 : i32
    return %c0_i32, %arg1 : i32, i32
  }
  func.func @transform_3(%arg0: i32, %arg1: i32) -> (i32, i32) {
    %c0_i32 = arith.constant 0 : i32
    %c0_i32_0 = arith.constant 0 : i32
    return %arg1, %c0_i32 : i32, i32
  }
  func.func @transform_4(%arg0: i32, %arg1: i32) -> (i32, i32) {
    %c0_i32 = arith.constant 0 : i32
    %c0_i32_0 = arith.constant 0 : i32
    return %arg0, %c0_i32 : i32, i32
  }
}

</mosaic_0001>

<bundles_post_ra>
// kernel: tpu_custom_call.1
= control target key start
LH: loop header
LB: loop body
LE: loop exit
PB: predicated region body
PF: predicated region fallthrough
CT: control target
= control target key end

     0   :  { %9 = vsyncpa [#allocation4], 0  ;;  %s1669_s0 = inlined_call_operand.hbm [shape: bf16[16,128], index: 0, kind: input, shape index: {}]   ;;  %s1670_s1 = inlined_call_operand.hbm [shape: bf16[128,512], index: 1, kind: input, shape index: {}]   ;;  %s1671_s2 = inlined_call_operand.hbm [shape: bf16[128,512], index: 2, kind: input, shape index: {}]   ;;  %s1672_s3 = inlined_call_operand.hbm [shape: bf16[512,128], index: 3, kind: input, shape index: {}]   ;;  %s1673_s4 = inlined_call_operand.hbm [shape: f32[16,128], index: 4, kind: output, shape index: {}]  }
   0x1   :  { %10 = vsyncpa [#allocation7], 0 }
   0x2   :  { %11 = vsyncpa [#allocation10], 0 }
   0x3   :  { %12 = vsyncpa [#allocation5], 0  ;;  %s1522_s15 = smov [#allocation6]   ;;  %s1404_s19 = scalar_lea.hbm %s1670_s1, 4096 }
   0x4   :  { %s30_s16 = sshll.u32 %s1522_s15, 4  ;;  %p1405_p0 = scmp.ne.s32.totalorder %s1670_s1, %s1404_s19  ;;  %s31_s16 = int_to_ptr.vmem [resolvable:$true] %s30_s16 }
   0x5   :  { %p1408_p1 = scmp.lt.u32.totalorder %s1404_s19, %s1670_s1 }
   0x7   :  { %p1410_p2 = pnand %p1408_p1, %p1405_p0 }
   0x9   :  { %1413 = shalt.err (!%p1410_p2)
}
   0xa   :  { %s1414_s24 = scalar_lea.vmem %s31_s16, 4096  ;;  %p1419_p4 = scmp.lt.s32.totalorder %s31_s16, %s31_s16 }
   0xb   :  { %p1415_p3 = scmp.ne.s32.totalorder %s31_s16, %s1414_s24  ;;  %p1420_p5 = scmp.lt.s32.totalorder %s1414_s24, %s1414_s24 }
   0xd   :  { %p1421_p6 = por %p1420_p5, %p1419_p4 }
   0xf   :  { %p1422_p7 = pnand %p1421_p6, %p1415_p3 }
  0x11   :  { %1425 = shalt.err (!%p1422_p7)
}
  0x12   :  { %s1523_s25 = smov 256   ;;  %s1524_s26 = smov 16  }
  0x13   :  { %36 = dma.hbm_to_vmem [thread:$0]  %s1670_s1, 4096, %s31_s16, [#allocation7], %s1523_s25, %s1523_s25, %s1524_s26  }
  0x14   :  { %s1525_s29 = smov [#allocation3]   ;;  %s1426_s7 = scalar_lea.hbm %s1669_s0, 128 }
  0x15   :  { %s18_s30 = sshll.u32 %s1525_s29, 4  ;;  %p1427_p8 = scmp.ne.s32.totalorder %s1669_s0, %s1426_s7  ;;  %s19_s30 = int_to_ptr.vmem [resolvable:$true] %s18_s30 }
  0x16   :  { %p1430_p9 = scmp.lt.u32.totalorder %s1426_s7, %s1669_s0 }
  0x18   :  { %p1432_p10 = pnand %p1430_p9, %p1427_p8 }
  0x1a   :  { %1435 = shalt.err (!%p1432_p10)
}
  0x1b   :  { %s1436_s12 = scalar_lea.vmem %s19_s30, 128  ;;  %p1441_p12 = scmp.lt.s32.totalorder %s19_s30, %s19_s30 }
  0x1c   :  { %p1437_p11 = scmp.ne.s32.totalorder %s19_s30, %s1436_s12  ;;  %p1442_p13 = scmp.lt.s32.totalorder %s1436_s12, %s1436_s12 }
  0x1e   :  { %p1443_p0 = por %p1442_p13, %p1441_p12 }
  0x20   :  { %p1444_p1 = pnand %p1443_p0, %p1437_p11 }
  0x22   :  { %1447 = shalt.err (!%p1444_p1)
}
  0x23   :  { %s1526_s1 = smov 64   ;;  %s1527_s13 = smov 4  }
  0x24   :  { %24 = dma.hbm_to_vmem [thread:$0]  %s1669_s0, 128, %s19_s30, [#allocation4], %s1526_s1, %s1526_s1, %s1527_s13  }
  0x25   :  { %s1528_s16 = smov [#allocation8]   ;;  %s1529_s18 = smov [#allocation9]  }
  0x26   :  { %s42_s17 = sshll.u32 %s1528_s16, 4  ;;  %s54_s19 = sshll.u32 %s1529_s18, 4  ;;  %s43_s17 = int_to_ptr.vmem [resolvable:$true] %s42_s17  ;;  %s1589_s19 = int_to_ptr.vmem [resolvable:$true] %s54_s19 }
  0x27   :  { %s1448_s22 = scalar_lea.hbm %s1671_s2, 4096 }
  0x28   :  { %p1449_p2 = scmp.ne.s32.totalorder %s1671_s2, %s1448_s22  ;;  %p1452_p3 = scmp.lt.u32.totalorder %s1448_s22, %s1671_s2 }
  0x2a   :  { %p1454_p4 = pnand %p1452_p3, %p1449_p2 }
  0x2c   :  { %1457 = shalt.err (!%p1454_p4)
}
  0x2d   :  { %s1458_s0 = scalar_lea.vmem %s43_s17, 4096  ;;  %p1463_p6 = scmp.lt.s32.totalorder %s43_s17, %s43_s17 }
  0x2e   :  { %p1459_p5 = scmp.ne.s32.totalorder %s43_s17, %s1458_s0  ;;  %p1464_p7 = scmp.lt.s32.totalorder %s1458_s0, %s1458_s0 }
  0x30   :  { %p1465_p8 = por %p1464_p7, %p1463_p6 }
  0x32   :  { %p1466_p9 = pnand %p1465_p8, %p1459_p5 }
  0x34   :  { %1469 = shalt.err (!%p1466_p9)
}
  0x35   :  { %48 = dma.hbm_to_vmem [thread:$0]  %s1671_s2, 4096, %s43_s17, [#allocation7], %s1523_s25, %s1523_s25, %s1524_s26  }
  0x36   :  { %s1470_s7 = scalar_lea.hbm %s1672_s3, 4096 }
  0x37   :  { %p1471_p10 = scmp.ne.s32.totalorder %s1672_s3, %s1470_s7  ;;  %p1474_p11 = scmp.lt.u32.totalorder %s1470_s7, %s1672_s3 }
  0x39   :  { %p1476_p12 = pnand %p1474_p11, %p1471_p10 }
  0x3b   :  { %1479 = shalt.err (!%p1476_p12)
}
  0x3c   :  { %s1480_s12 = scalar_lea.vmem %s1589_s19, 4096  ;;  %p1485_p0 = scmp.lt.s32.totalorder %s1589_s19, %s1589_s19 }
  0x3d   :  { %p1481_p13 = scmp.ne.s32.totalorder %s1589_s19, %s1480_s12  ;;  %p1486_p1 = scmp.lt.s32.totalorder %s1480_s12, %s1480_s12 }
  0x3f   :  { %p1487_p2 = por %p1486_p1, %p1485_p0 }
  0x41   :  { %p1488_p3 = pnand %p1487_p2, %p1481_p13 }
  0x43   :  { %1491 = shalt.err (!%p1488_p3)
}
  0x44   :  { %60 = dma.hbm_to_vmem [thread:$0]  %s1672_s3, 4096, %s1589_s19, [#allocation10], %s1526_s1, %s1526_s1, %s1527_s13  }
  0x45   :  { %1514 = dma.done.wait [#allocation4], 128  }
  0x46   :  { %1515 = vsyncadd [#allocation4], 4294967168 }
  0x47   :  { %1516 = dma.done.wait [#allocation7], 8192  }
  0x48   :  { %1517 = vsyncadd [#allocation7], 4294959104 }
  0x49   :  { %1518 = dma.done.wait [#allocation10], 4096  }
  0x4a   :  { %1519 = vsyncadd [#allocation10], 4294963200  ;;  %v1530_v0 = vmov 0   ;;  %v1243_v1 = vld [vmem:[#allocation6 + $0x4] ss:$16 sps:$4 sm:$0xff]   ;;  %v1628_v35 = vld [vmem:[#allocation3] sm:$0xff]  }
  0x4b   :  { %312 = vmatprep.mubr.bf16.mxu0 %v1530_v0  ;;  %355 = vmatprep.mubr.bf16.mxu1 %v1530_v0  ;;  %v1245_v2 = vld [vmem:[#allocation6 + $0xc] ss:$16 sps:$4 sm:$0xff]   ;;  %v1247_v3 = vld [vmem:[#allocation6] ss:$16 sps:$4 sm:$0xff]   ;;  %v1248_v4 = vld [vmem:[#allocation6 + $0x8] ss:$16 sps:$4 sm:$0xff]  }
  0x4c   :  { %280 = vmatprep.subr.bf16.mxu0 %v1243_v1  ;;  %323 = vmatprep.subr.bf16.mxu1 %v1245_v2  ;;  %v1249_v5 = vld [vmem:[#allocation6 + $0x24] ss:$16 sps:$4 sm:$0xff]   ;;  %v1251_v6 = vld [vmem:[#allocation6 + $0x2c] ss:$16 sps:$4 sm:$0xff]   ;;  %v1253_v7 = vld [vmem:[#allocation6 + $0x20] ss:$16 sps:$4 sm:$0xff]  }
  0x4d   :  { %281 = vmatpush1.bf16.msra.mxu0 %v1247_v3  ;;  %324 = vmatpush1.bf16.msra.mxu1 %v1248_v4  ;;  %v1254_v8 = vld [vmem:[#allocation6 + $0x28] ss:$16 sps:$4 sm:$0xff]   ;;  %v1255_v9 = vld [vmem:[#allocation6 + $0x44] ss:$16 sps:$4 sm:$0xff]   ;;  %v1257_v10 = vld [vmem:[#allocation6 + $0x4c] ss:$16 sps:$4 sm:$0xff]  }
  0x4e   :  { %282 = vmatprep.subr.bf16.mxu0 %v1249_v5  ;;  %325 = vmatprep.subr.bf16.mxu1 %v1251_v6  ;;  %v1259_v11 = vld [vmem:[#allocation6 + $0x40] ss:$16 sps:$4 sm:$0xff]   ;;  %v1260_v12 = vld [vmem:[#allocation6 + $0x48] ss:$16 sps:$4 sm:$0xff]   ;;  %v1261_v13 = vld [vmem:[#allocation6 + $0x64] ss:$16 sps:$4 sm:$0xff]  }
  0x4f   :  { %v1263_v14 = vld [vmem:[#allocation6 + $0x6c] ss:$16 sps:$4 sm:$0xff]   ;;  %v1265_v15 = vld [vmem:[#allocation6 + $0x60] ss:$16 sps:$4 sm:$0xff]   ;;  %v1266_v16 = vld [vmem:[#allocation6 + $0x68] ss:$16 sps:$4 sm:$0xff]  }
  0x50   :  { %v1267_v17 = vld [vmem:[#allocation6 + $0x84] ss:$16 sps:$4 sm:$0xff]   ;;  %v1269_v18 = vld [vmem:[#allocation6 + $0x8c] ss:$16 sps:$4 sm:$0xff]   ;;  %v1271_v19 = vld [vmem:[#allocation6 + $0x80] ss:$16 sps:$4 sm:$0xff]  }
  0x51   :  { %283 = vmatpush1.bf16.msra.mxu0 %v1253_v7  ;;  %326 = vmatpush1.bf16.msra.mxu1 %v1254_v8  ;;  %v1272_v20 = vld [vmem:[#allocation6 + $0x88] ss:$16 sps:$4 sm:$0xff]   ;;  %v1273_v21 = vld [vmem:[#allocation6 + $0xa4] ss:$16 sps:$4 sm:$0xff]   ;;  %v1275_v22 = vld [vmem:[#allocation6 + $0xac] ss:$16 sps:$4 sm:$0xff]  }
  0x52   :  { %284 = vmatprep.subr.bf16.mxu0 %v1255_v9  ;;  %327 = vmatprep.subr.bf16.mxu1 %v1257_v10  ;;  %v1277_v23 = vld [vmem:[#allocation6 + $0xa0] ss:$16 sps:$4 sm:$0xff]   ;;  %v1278_v24 = vld [vmem:[#allocation6 + $0xa8] ss:$16 sps:$4 sm:$0xff]   ;;  %v1279_v25 = vld [vmem:[#allocation6 + $0xc4] ss:$16 sps:$4 sm:$0xff]  }
  0x53   :  { %v1281_v26 = vld [vmem:[#allocation6 + $0xcc] ss:$16 sps:$4 sm:$0xff]   ;;  %v1283_v27 = vld [vmem:[#allocation6 + $0xc0] ss:$16 sps:$4 sm:$0xff]   ;;  %v1284_v28 = vld [vmem:[#allocation6 + $0xc8] ss:$16 sps:$4 sm:$0xff]  }
  0x54   :  { %v1285_v29 = vld [vmem:[#allocation6 + $0xe4] ss:$16 sps:$4 sm:$0xff]   ;;  %v1287_v30 = vld [vmem:[#allocation6 + $0xec] ss:$16 sps:$4 sm:$0xff]   ;;  %v1289_v31 = vld [vmem:[#allocation6 + $0xe0] ss:$16 sps:$4 sm:$0xff]  }
  0x55   :  { %285 = vmatpush1.bf16.msra.mxu0 %v1259_v11  ;;  %328 = vmatpush1.bf16.msra.mxu1 %v1260_v12  ;;  %v1290_v32 = vld [vmem:[#allocation6 + $0xe8] ss:$16 sps:$4 sm:$0xff]   ;;  %v1294_v33 = vld [vmem:[#allocation8 + $0x4] ss:$16 sps:$4 sm:$0xff]   ;;  %v1297_v34 = vld [vmem:[#allocation8 + $0xc] ss:$16 sps:$4 sm:$0xff]  }
  0x56   :  { %286 = vmatprep.subr.bf16.mxu0 %v1261_v13  ;;  %329 = vmatprep.subr.bf16.mxu1 %v1263_v14  ;;  %v1292_v36 = vld [vmem:[#allocation8] ss:$16 sps:$4 sm:$0xff]   ;;  %v1295_v37 = vld [vmem:[#allocation8 + $0x8] ss:$16 sps:$4 sm:$0xff]   ;;  %v1300_v38 = vld [vmem:[#allocation8 + $0x24] ss:$16 sps:$4 sm:$0xff]  }
  0x57   :  { %v1303_v39 = vld [vmem:[#allocation8 + $0x2c] ss:$16 sps:$4 sm:$0xff]   ;;  %v1298_v40 = vld [vmem:[#allocation8 + $0x20] ss:$16 sps:$4 sm:$0xff]   ;;  %v1301_v41 = vld [vmem:[#allocation8 + $0x28] ss:$16 sps:$4 sm:$0xff]  }
  0x58   :  { %v1306_v42 = vld [vmem:[#allocation8 + $0x44] ss:$16 sps:$4 sm:$0xff]   ;;  %v1309_v43 = vld [vmem:[#allocation8 + $0x4c] ss:$16 sps:$4 sm:$0xff]   ;;  %v1304_v44 = vld [vmem:[#allocation8 + $0x40] ss:$16 sps:$4 sm:$0xff]  }
  0x59   :  { %287 = vmatpush1.bf16.msra.mxu0 %v1265_v15  ;;  %330 = vmatpush1.bf16.msra.mxu1 %v1266_v16  ;;  %v1307_v45 = vld [vmem:[#allocation8 + $0x48] ss:$16 sps:$4 sm:$0xff]   ;;  %v1312_v46 = vld [vmem:[#allocation8 + $0x64] ss:$16 sps:$4 sm:$0xff]   ;;  %v1315_v47 = vld [vmem:[#allocation8 + $0x6c] ss:$16 sps:$4 sm:$0xff]  }
  0x5a   :  { %288 = vmatprep.subr.bf16.mxu0 %v1267_v17  ;;  %331 = vmatprep.subr.bf16.mxu1 %v1269_v18  ;;  %v1310_v48 = vld [vmem:[#allocation8 + $0x60] ss:$16 sps:$4 sm:$0xff]   ;;  %v1313_v49 = vld [vmem:[#allocation8 + $0x68] ss:$16 sps:$4 sm:$0xff]   ;;  %v1318_v50 = vld [vmem:[#allocation8 + $0x84] ss:$16 sps:$4 sm:$0xff]  }
  0x5b   :  { %v1321_v51 = vld [vmem:[#allocation8 + $0x8c] ss:$16 sps:$4 sm:$0xff]   ;;  %v1316_v52 = vld [vmem:[#allocation8 + $0x80] ss:$16 sps:$4 sm:$0xff]   ;;  %v1319_v53 = vld [vmem:[#allocation8 + $0x88] ss:$16 sps:$4 sm:$0xff]  }
  0x5c   :  { %v1324_v54 = vld [vmem:[#allocation8 + $0xa4] ss:$16 sps:$4 sm:$0xff]   ;;  %v1327_v55 = vld [vmem:[#allocation8 + $0xac] ss:$16 sps:$4 sm:$0xff]   ;;  %v1322_v56 = vld [vmem:[#allocation8 + $0xa0] ss:$16 sps:$4 sm:$0xff]  }
  0x5d   :  { %289 = vmatpush1.bf16.msra.mxu0 %v1271_v19  ;;  %332 = vmatpush1.bf16.msra.mxu1 %v1272_v20  ;;  %v1325_v57 = vld [vmem:[#allocation8 + $0xa8] ss:$16 sps:$4 sm:$0xff]   ;;  %v1330_v58 = vld [vmem:[#allocation8 + $0xc4] ss:$16 sps:$4 sm:$0xff]   ;;  %v1333_v59 = vld [vmem:[#allocation8 + $0xcc] ss:$16 sps:$4 sm:$0xff]  }
  0x5e   :  { %290 = vmatprep.subr.bf16.mxu0 %v1273_v21  ;;  %333 = vmatprep.subr.bf16.mxu1 %v1275_v22  ;;  %v1328_v60 = vld [vmem:[#allocation8 + $0xc0] ss:$16 sps:$4 sm:$0xff]   ;;  %v1331_v61 = vld [vmem:[#allocation8 + $0xc8] ss:$16 sps:$4 sm:$0xff]   ;;  %v1336_v62 = vld [vmem:[#allocation8 + $0xe4] ss:$16 sps:$4 sm:$0xff]  }
  0x5f   :  { %v1339_v63 = vld [vmem:[#allocation8 + $0xec] ss:$16 sps:$4 sm:$0xff]   ;;  %v1337_v1 = vld [vmem:[#allocation8 + $0xe8] ss:$16 sps:$4 sm:$0xff]   ;;  %v1340_v2 = vld [vmem:[#allocation9 + $0x40] sm:$0xff]   ;;  %s1531_s3 = smov [#allocation11]  }
  0x60   :  { %v1341_v3 = vld [vmem:[#allocation9 + $0xc0] sm:$0xff]   ;;  %v1344_v6 = vld [vmem:[#allocation9 + $0x48] sm:$0xff]   ;;  %v1348_v10 = vld [vmem:[#allocation9 + $0x50] sm:$0xff]   ;;  %s1068_s26 = sshll.u32 %s1531_s3, 4  ;;  %s1069_s26 = int_to_ptr.vmem [resolvable:$true] %s1068_s26 }
  0x61   :  { %291 = vmatpush1.bf16.msra.mxu0 %v1277_v23  ;;  %334 = vmatpush1.bf16.msra.mxu1 %v1278_v24  ;;  %v1342_v4 = vld [vmem:[#allocation9] sm:$0xff]   ;;  %v1345_v7 = vld [vmem:[#allocation9 + $0xc8] sm:$0xff]   ;;  %v1349_v11 = vld [vmem:[#allocation9 + $0xd0] sm:$0xff]   ;;  %s1492_s1 = scalar_lea.vmem %s1069_s26, 256  ;;  %p1497_p5 = scmp.lt.s32.totalorder %s1069_s26, %s1069_s26 }
  0x62   :  { %292 = vmatprep.subr.bf16.mxu0 %v1279_v25  ;;  %335 = vmatprep.subr.bf16.mxu1 %v1281_v26  ;;  %v1343_v5 = vld [vmem:[#allocation9 + $0x80] sm:$0xff]   ;;  %v1346_v8 = vld [vmem:[#allocation9 + $0x8] sm:$0xff]   ;;  %v1350_v12 = vld [vmem:[#allocation9 + $0x10] sm:$0xff]   ;;  %p1493_p4 = scmp.ne.s32.totalorder %s1069_s26, %s1492_s1  ;;  %p1498_p6 = scmp.lt.s32.totalorder %s1492_s1, %s1492_s1 }
  0x63   :  { %v1347_v9 = vld [vmem:[#allocation9 + $0x88] sm:$0xff]   ;;  %v1351_v13 = vld [vmem:[#allocation9 + $0x90] sm:$0xff]   ;;  %v1352_v14 = vld [vmem:[#allocation9 + $0x58] sm:$0xff]  }
  0x64   :  { %v1353_v15 = vld [vmem:[#allocation9 + $0xd8] sm:$0xff]   ;;  %v1356_v18 = vld [vmem:[#allocation9 + $0x60] sm:$0xff]   ;;  %v1360_v22 = vld [vmem:[#allocation9 + $0x68] sm:$0xff]   ;;  %p1499_p7 = por %p1498_p6, %p1497_p5 }
  0x65   :  { %293 = vmatpush1.bf16.msra.mxu0 %v1283_v27  ;;  %336 = vmatpush1.bf16.msra.mxu1 %v1284_v28  ;;  %v1354_v16 = vld [vmem:[#allocation9 + $0x18] sm:$0xff]   ;;  %v1357_v19 = vld [vmem:[#allocation9 + $0xe0] sm:$0xff]   ;;  %v1361_v23 = vld [vmem:[#allocation9 + $0xe8] sm:$0xff]  }
  0x66   :  { %294 = vmatprep.subr.bf16.mxu0 %v1285_v29  ;;  %337 = vmatprep.subr.bf16.mxu1 %v1287_v30  ;;  %v1355_v17 = vld [vmem:[#allocation9 + $0x98] sm:$0xff]   ;;  %v1358_v20 = vld [vmem:[#allocation9 + $0x20] sm:$0xff]   ;;  %v1362_v24 = vld [vmem:[#allocation9 + $0x28] sm:$0xff]   ;;  %p1500_p8 = pnand %p1499_p7, %p1493_p4 }
  0x67   :  { %v1359_v21 = vld [vmem:[#allocation9 + $0xa0] sm:$0xff]   ;;  %v1363_v25 = vld [vmem:[#allocation9 + $0xa8] sm:$0xff]   ;;  %v1364_v26 = vld [vmem:[#allocation9 + $0x70] sm:$0xff]  }
  0x68   :  { %v1365_v27 = vld [vmem:[#allocation9 + $0xf0] sm:$0xff]   ;;  %v1368_v30 = vld [vmem:[#allocation9 + $0x78] sm:$0xff]  }
  0x69   :  { %295 = vmatpush1.bf16.msra.mxu0 %v1289_v31  ;;  %338 = vmatpush1.bf16.msra.mxu1 %v1290_v32  ;;  %v1366_v28 = vld [vmem:[#allocation9 + $0x30] sm:$0xff]   ;;  %v1369_v31 = vld [vmem:[#allocation9 + $0xf8] sm:$0xff]  }
  0x6a   :  { %558 = vmatprep.subr.bf16.mxu0 %v1294_v33  ;;  %601 = vmatprep.subr.bf16.mxu1 %v1297_v34  ;;  %v1367_v29 = vld [vmem:[#allocation9 + $0xb0] sm:$0xff]   ;;  %v1370_v32 = vld [vmem:[#allocation9 + $0x38] sm:$0xff]  }
  0x6b   :  { %v1371_v33 = vld [vmem:[#allocation9 + $0xb8] sm:$0xff]  }
  0x6c   :  { %313 = vmatmul.mubr.bf16.vlgmr.msra.gmra.mrb[0].mxu0 %v1628_v35  ;;  %356 = vmatmul.mubr.bf16.vlgmr.msra.gmra.mrb[0].mxu1 %v1628_v35 }
  0x6d   :  { %559 = vmatpush1.bf16.msra.mxu0 %v1292_v36  ;;  %602 = vmatpush1.bf16.msra.mxu1 %v1295_v37 }
  0x6e   :  { %560 = vmatprep.subr.bf16.mxu0 %v1300_v38  ;;  %603 = vmatprep.subr.bf16.mxu1 %v1303_v39 }
  0x6f   :  { %590 = vmatprep.mubr.bf16.mxu0 %v1530_v0  ;;  %633 = vmatprep.mubr.bf16.mxu1 %v1530_v0  ;;  %v1334_v0 = vld [vmem:[#allocation8 + $0xe0] ss:$16 sps:$4 sm:$0xff]  }
  0x71   :  { %561 = vmatpush1.bf16.msra.mxu0 %v1298_v40  ;;  %604 = vmatpush1.bf16.msra.mxu1 %v1301_v41 }
  0x72   :  { %562 = vmatprep.subr.bf16.mxu0 %v1306_v42  ;;  %605 = vmatprep.subr.bf16.mxu1 %v1309_v43 }
  0x75   :  { %563 = vmatpush1.bf16.msra.mxu0 %v1304_v44  ;;  %606 = vmatpush1.bf16.msra.mxu1 %v1307_v45 }
  0x76   :  { %564 = vmatprep.subr.bf16.mxu0 %v1312_v46  ;;  %607 = vmatprep.subr.bf16.mxu1 %v1315_v47 }
  0x79   :  { %565 = vmatpush1.bf16.msra.mxu0 %v1310_v48  ;;  %608 = vmatpush1.bf16.msra.mxu1 %v1313_v49 }
  0x7a   :  { %566 = vmatprep.subr.bf16.mxu0 %v1318_v50  ;;  %609 = vmatprep.subr.bf16.mxu1 %v1321_v51 }
  0x7d   :  { %567 = vmatpush1.bf16.msra.mxu0 %v1316_v52  ;;  %610 = vmatpush1.bf16.msra.mxu1 %v1319_v53 }
  0x7e   :  { %568 = vmatprep.subr.bf16.mxu0 %v1324_v54  ;;  %611 = vmatprep.subr.bf16.mxu1 %v1327_v55 }
  0x81   :  { %569 = vmatpush1.bf16.msra.mxu0 %v1322_v56  ;;  %612 = vmatpush1.bf16.msra.mxu1 %v1325_v57 }
  0x82   :  { %570 = vmatprep.subr.bf16.mxu0 %v1330_v58  ;;  %613 = vmatprep.subr.bf16.mxu1 %v1333_v59 }
  0x85   :  { %571 = vmatpush1.bf16.msra.mxu0 %v1328_v60  ;;  %614 = vmatpush1.bf16.msra.mxu1 %v1331_v61 }
  0x86   :  { %572 = vmatprep.subr.bf16.mxu0 %v1336_v62  ;;  %615 = vmatprep.subr.bf16.mxu1 %v1339_v63 }
  0x89   :  { %573 = vmatpush1.bf16.msra.mxu0 %v1334_v0  ;;  %616 = vmatpush1.bf16.msra.mxu1 %v1337_v1 }
  0x8a   :  { %1187 = vmatprep.subr.bf16.mxu0 %v1340_v2  ;;  %1209 = vmatprep.subr.bf16.mxu1 %v1341_v3 }
  0x8c   :  { %591 = vmatmul.mubr.bf16.vlgmr.msra.gmra.mrb[4].mxu0 %v1628_v35  ;;  %634 = vmatmul.mubr.bf16.vlgmr.msra.gmra.mrb[4].mxu1 %v1628_v35 }
  0x8d   :  { %1188 = vmatpush3.bf16.msra.mxu0 %v1342_v4  ;;  %1210 = vmatpush3.bf16.msra.mxu1 %v1343_v5 }
  0x8e   :  { %1189 = vmatprep.subr.bf16.mxu0 %v1344_v6  ;;  %1211 = vmatprep.subr.bf16.mxu1 %v1345_v7 }
  0x91   :  { %1190 = vmatpush3.bf16.msra.mxu0 %v1346_v8  ;;  %1212 = vmatpush3.bf16.msra.mxu1 %v1347_v9 }
  0x92   :  { %1191 = vmatprep.subr.bf16.mxu0 %v1348_v10  ;;  %1213 = vmatprep.subr.bf16.mxu1 %v1349_v11 }
  0x95   :  { %1192 = vmatpush3.bf16.msra.mxu0 %v1350_v12  ;;  %1214 = vmatpush3.bf16.msra.mxu1 %v1351_v13 }
  0x96   :  { %1193 = vmatprep.subr.bf16.mxu0 %v1352_v14  ;;  %1215 = vmatprep.subr.bf16.mxu1 %v1353_v15 }
  0x99   :  { %1194 = vmatpush3.bf16.msra.mxu0 %v1354_v16  ;;  %1216 = vmatpush3.bf16.msra.mxu1 %v1355_v17 }
  0x9a   :  { %1195 = vmatprep.subr.bf16.mxu0 %v1356_v18  ;;  %1217 = vmatprep.subr.bf16.mxu1 %v1357_v19 }
  0x9d   :  { %1196 = vmatpush3.bf16.msra.mxu0 %v1358_v20  ;;  %1218 = vmatpush3.bf16.msra.mxu1 %v1359_v21 }
  0x9e   :  { %1197 = vmatprep.subr.bf16.mxu0 %v1360_v22  ;;  %1219 = vmatprep.subr.bf16.mxu1 %v1361_v23 }
  0xa1   :  { %1198 = vmatpush3.bf16.msra.mxu0 %v1362_v24  ;;  %1220 = vmatpush3.bf16.msra.mxu1 %v1363_v25 }
  0xa2   :  { %1199 = vmatprep.subr.bf16.mxu0 %v1364_v26  ;;  %1221 = vmatprep.subr.bf16.mxu1 %v1365_v27 }
  0xa5   :  { %1200 = vmatpush3.bf16.msra.mxu0 %v1366_v28  ;;  %1222 = vmatpush3.bf16.msra.mxu1 %v1367_v29 }
  0xa6   :  { %1201 = vmatprep.subr.bf16.mxu0 %v1368_v30  ;;  %1223 = vmatprep.subr.bf16.mxu1 %v1369_v31 }
  0xa9   :  { %1202 = vmatpush3.bf16.msra.mxu0 %v1370_v32  ;;  %1224 = vmatpush3.bf16.msra.mxu1 %v1371_v33 }
 0x13f   :  { %v314_v34 = vpop.f32.mrb[0].mxu0  ;;  %v1636_v35 = vpop.f32.mrb[0].mxu1 }
 0x140   :  { %v1638_v36 = vpop.f32.mrb[1].mxu0  ;;  %v1640_v37 = vpop.f32.mrb[1].mxu1 }
 0x141   :  { %v1642_v38 = vpop.f32.mrb[2].mxu0  ;;  %v1644_v39 = vpop.f32.mrb[2].mxu1 }
 0x142   :  { %v1646_v40 = vpop.f32.mrb[3].mxu0  ;;  %v1648_v41 = vpop.f32.mrb[3].mxu1 }
 0x15f   :  { %v592_v42 = vpop.f32.mrb[4].mxu0  ;;  %v635_v43 = vpop.f32.mrb[4].mxu1 }
 0x160   :  { %v1147_v44 = vmul.f32 -1.442695, %v592_v42  ;;  %v1149_v45 = vmul.f32 -1.442695, %v635_v43  ;;  %v594_v46 = vpop.f32.mrb[5].mxu0  ;;  %v637_v47 = vpop.f32.mrb[5].mxu1 }
 0x161   :  { %v1148_v48 = vmul.f32 -1.442695, %v594_v46  ;;  %v1150_v49 = vmul.f32 -1.442695, %v637_v47  ;;  %v596_v50 = vpop.f32.mrb[6].mxu0  ;;  %v639_v51 = vpop.f32.mrb[6].mxu1 }
 0x162   :  { %1372 = vpow2.f32 %v1147_v44  ;;  %v1151_v52 = vmul.f32 -1.442695, %v596_v50  ;;  %v598_v53 = vpop.f32.mrb[7].mxu0  ;;  %v641_v54 = vpop.f32.mrb[7].mxu1  ;;  %v1153_v55 = vmul.f32 -1.442695, %v639_v51 }
 0x163   :  { %1374 = vpow2.f32 %v1149_v45  ;;  %v1152_v56 = vmul.f32 -1.442695, %v598_v53  ;;  %v1154_v57 = vmul.f32 -1.442695, %v641_v54 }
 0x164   :  { %1376 = vpow2.f32 %v1148_v48 }
 0x165   :  { %1378 = vpow2.f32 %v1150_v49 }
 0x166   :  { %1380 = vpow2.f32 %v1151_v52 }
 0x167   :  { %1382 = vpow2.f32 %v1153_v55 }
 0x168   :  { %1384 = vpow2.f32 %v1152_v56 }
 0x169   :  { %1386 = vpow2.f32 %v1154_v57 }
 0x16c   :  { %v1373_v58 = vpop.eup %1372 }
 0x16d   :  { %v1375_v59 = vpop.eup %1374  ;;  %v668_v60 = vadd.f32 1.0, %v1373_v58 }
 0x16e   :  { %v1377_v61 = vpop.eup %1376  ;;  %v670_v62 = vadd.f32 1.0, %v1375_v59 }
 0x16f   :  { %v1379_v63 = vpop.eup %1378  ;;  %1388 = vrcp.f32 %v668_v60  ;;  %v669_v0 = vadd.f32 1.0, %v1377_v61 }
 0x170   :  { %v1381_v1 = vpop.eup %1380  ;;  %1390 = vrcp.f32 %v670_v62  ;;  %v671_v2 = vadd.f32 1.0, %v1379_v63 }
 0x171   :  { %v1383_v3 = vpop.eup %1382  ;;  %1392 = vrcp.f32 %v669_v0  ;;  %v672_v4 = vadd.f32 1.0, %v1381_v1 }
 0x172   :  { %v1385_v5 = vpop.eup %1384  ;;  %1394 = vrcp.f32 %v671_v2  ;;  %v674_v6 = vadd.f32 1.0, %v1383_v3 }
 0x173   :  { %v1387_v7 = vpop.eup %1386  ;;  %1396 = vrcp.f32 %v672_v4  ;;  %v673_v8 = vadd.f32 1.0, %v1385_v5 }
 0x174   :  { %1398 = vrcp.f32 %v674_v6  ;;  %v675_v9 = vadd.f32 1.0, %v1387_v7 }
 0x175   :  { %1400 = vrcp.f32 %v673_v8 }
 0x176   :  { %1402 = vrcp.f32 %v675_v9 }
 0x179   :  { %v1389_v10 = vpop.eup %1388 }
 0x17a   :  { %v1391_v11 = vpop.eup %1390  ;;  %v692_v12 = vmul.f32 %v1389_v10, %v592_v42 }
 0x17b   :  { %v1393_v13 = vpop.eup %1392  ;;  %v694_v14 = vmul.f32 %v1391_v11, %v635_v43 }
 0x17c   :  { %v1395_v15 = vpop.eup %1394  ;;  %v700_v16 = vmul.f32 %v692_v12, %v314_v34  ;;  %v693_v17 = vmul.f32 %v1393_v13, %v594_v46 }
 0x17d   :  { %v1397_v18 = vpop.eup %1396  ;;  %v702_v19 = vmul.f32 %v694_v14, %v1636_v35  ;;  %v695_v20 = vmul.f32 %v1395_v15, %v637_v47 }
 0x17e   :  { %v1399_v21 = vpop.eup %1398  ;;  %v701_v22 = vmul.f32 %v693_v17, %v1638_v36  ;;  %v696_v23 = vmul.f32 %v1397_v18, %v596_v50 }
 0x17f   :  { %v1401_v24 = vpop.eup %1400  ;;  %v703_v25 = vmul.f32 %v695_v20, %v1640_v37  ;;  %v698_v26 = vmul.f32 %v1399_v21, %v639_v51 }
 0x180   :  { %v1403_v27 = vpop.eup %1402  ;;  %v704_v28 = vmul.f32 %v696_v23, %v1642_v38  ;;  %v697_v29 = vmul.f32 %v1401_v24, %v598_v53 }
 0x181   :  { %v706_v30 = vmul.f32 %v698_v26, %v1644_v39  ;;  %v699_v31 = vmul.f32 %v1403_v27, %v641_v54 }
 0x182   :  { %v708_v32 = vpack.c.bf16 %v704_v28, %v700_v16  ;;  %v705_v33 = vmul.f32 %v697_v29, %v1646_v40 }
 0x183   :  { %v710_v34 = vpack.c.bf16 %v706_v30, %v702_v19  ;;  %v707_v35 = vmul.f32 %v699_v31, %v1648_v41 }
 0x184   :  { %v709_v42 = vpack.c.bf16 %v705_v33, %v701_v22 }
 0x185   :  { %v711_v36 = vpack.c.bf16 %v707_v35, %v703_v25 }
 0x186   :  { %1002 = vmatprep.mubr.bf16.mxu0 %v709_v42 }
 0x187   :  { %1043 = vmatprep.mubr.bf16.mxu1 %v711_v36  ;;  %1003 = vmatmul.mubr.bf16.vlgmr.msra.gmra.mrb[8].mxu0 %v708_v32 }
 0x188   :  { %1044 = vmatmul.mubr.bf16.vlgmr.msra.gmra.mrb[8].mxu1 %v710_v34 }
 0x25a   :  { %v1203_v37 = vpop.f32.mrb[8].mxu0 }
 0x25b   :  { %v1225_v43 = vpop.f32.mrb[8].mxu1  ;;  %v1204_v44 = vpop.f32.mrb[9].mxu0 }
 0x25c   :  { %v1205_v38 = vadd.f32 %v1204_v44, %v1203_v37  ;;  %v1226_v45 = vpop.f32.mrb[9].mxu1  ;;  %v1206_v46 = vpop.f32.mrb[10].mxu0 }
 0x25d   :  { %v1227_v39 = vadd.f32 %v1226_v45, %v1225_v43  ;;  %v1228_v47 = vpop.f32.mrb[10].mxu1  ;;  %v1207_v48 = vpop.f32.mrb[11].mxu0 }
 0x25e   :  { %v1208_v40 = vadd.f32 %v1207_v48, %v1206_v46  ;;  %v1229_v49 = vpop.f32.mrb[11].mxu1 }
 0x25f   :  { %v1046_v41 = vadd.f32 %v1227_v39, %v1205_v38  ;;  %v1230_v50 = vadd.f32 %v1229_v49, %v1228_v47 }
 0x261   :  { %1061 = vst [vmem:[#allocation11] sm:$0xff] %v1046_v41  ;;  %v1049_v51 = vadd.f32 %v1230_v50, %v1208_v40 }
 0x263   :  { %1062 = vst [vmem:[#allocation11 + $0x8] sm:$0xff] %v1049_v51 }
 0x264   :  { %1503 = shalt.err (!%p1500_p8)
}
 0x265   :  { %s1504_s15 = scalar_lea.hbm %s1673_s4, 256 }
 0x266   :  { %p1505_p9 = scmp.ne.s32.totalorder %s1673_s4, %s1504_s15  ;;  %p1508_p10 = scmp.lt.u32.totalorder %s1504_s15, %s1673_s4 }
 0x268   :  { %p1510_p11 = pnand %p1508_p10, %p1505_p9 }
 0x26a   :  { %1513 = shalt.err (!%p1510_p11)
}
 0x26b   :  { %s1532_s20 = smov 128   ;;  %s1533_s21 = smov 8  }
 0x26c   :  { %1074 = dma.vmem_to_hbm [thread:$0]  %s1069_s26, 256, %s1673_s4, [#allocation5], %s1532_s20, %s1532_s20, %s1533_s21  }
 0x26d   :  { %1520 = dma.done.wait [#allocation5], 256  }
 0x26e   :  { %1521 = vsyncadd [#allocation5], 4294967040 }
 0x26f   :  { %1078 = vsyncpa [#allocation4], 1 }
 0x270   :  { %1079 = vsyncpa [#allocation7], 1 }
 0x271   :  { %1080 = vsyncpa [#allocation10], 1 }
 0x272   :  { %1081 = vsyncpa [#allocation5], 1 }

</bundles_post_ra>
